<compile_context>
chip_gen: v5e
topology: v5e:2x2
jax: 0.10.0
libtpu: 0.0.40
codegen_flags: <defaults>
</compile_context>

<pallas_src>
import functools
import math

import jax
import jax.numpy as jnp
from jax import lax
from jax.experimental import pallas as pl
from jax.experimental.pallas import tpu as pltpu


# Total VMEM working-set budget per grid step (bytes):
#   2 * x_tile (double-buffered input) + 2 * out_tile (double-buffered output)
#   + ~3 * f32 tile (x_f32, xc, y intermediates) + params (negligible).
_WORKSET_BUDGET = 28 * 1024 * 1024


def _ln_kernel_rows(x_ref, w_ref, b_ref, o_ref, *, eps):
    # x: (TM, E); w, b: (1, E) f32. Stats in f32, reduce over lanes (axis -1).
    x = x_ref[...].astype(jnp.float32)
    mean = jnp.mean(x, axis=-1, keepdims=True)
    xc = x - mean
    var = jnp.mean(xc * xc, axis=-1, keepdims=True)
    rstd = lax.rsqrt(var + eps)                    # EUP slot (free vs VPU divide)
    y = xc * rstd * w_ref[...] + b_ref[...]
    o_ref[...] = y.astype(o_ref.dtype)


def _ln_kernel_cols(x_ref, w_ref, b_ref, o_ref, *, eps):
    # Lane-dense layout: x: (E, TM) with rows on lanes; w, b: (E, 1) f32.
    # Reduce over sublanes (axis 0); output stores are full-lane (unmasked).
    x = x_ref[...].astype(jnp.float32)
    mean = jnp.mean(x, axis=0, keepdims=True)      # (1, TM)
    xc = x - mean
    var = jnp.mean(xc * xc, axis=0, keepdims=True)
    rstd = lax.rsqrt(var + eps)
    y = xc * rstd * w_ref[...] + b_ref[...]
    o_ref[...] = y.astype(o_ref.dtype)


def _pick_row_tile(n, e, itemsize, align):
    """Rows per tile, byte-budgeted against _WORKSET_BUDGET.

    Per tile-row bytes = E * (2*in + 2*out + 3*f32) = E * (4*itemsize + 12).
    `align` is 8 (row-major path, sublane axis) or 128 (lane-dense path, lane axis).
    """
    per_row = e * (4 * itemsize + 3 * 4)
    tm = max(align, _WORKSET_BUDGET // per_row)
    # Megacore: ensure >= 2 row tiles so ("parallel",) can shard across v7x's 2 TCs.
    half = (pl.cdiv(n, 2) // align) * align
    if half >= align:
        tm = min(tm, half)
    tm = min(tm, n)
    if tm < n:
        tm = max(align, (tm // align) * align)     # tile-aligned unless full dim
    return tm


def _vmem_limit(tm, e, itemsize):
    work = tm * e * (4 * itemsize + 3 * 4) + 2 * e * 4
    # 1.5x headroom for compiler scratch; >=16 MiB floor; <=48 MiB so the working
    # set stays inside v7x's 64 MiB per-TC physical VMEM (v5e/v6e have 128 MiB).
    return int(min(48 * 1024 * 1024, max(16 * 1024 * 1024, (work * 3) // 2)))


def esm1_layernorm_pallas(x, weight=None, bias=None, *, hidden_size, eps=1e-12):
    hidden_size = (hidden_size,) if isinstance(hidden_size, int) else tuple(hidden_size)
    n_h = len(hidden_size)
    assert x.shape[-n_h:] == hidden_size, (x.shape, hidden_size)

    lead_shape = x.shape[:-n_h]
    E = math.prod(hidden_size)
    x2d = x.reshape(-1, E)
    N = x2d.shape[0]
    itemsize = x2d.dtype.itemsize

    # Params cast to f32 once in the wrapper (tiny; stays resident across the grid).
    if weight is None:      # affine=False path of the module
        w = jnp.ones((E,), dtype=jnp.float32)
    else:
        w = weight.reshape(E).astype(jnp.float32)
    if bias is None:
        b = jnp.zeros((E,), dtype=jnp.float32)
    else:
        b = bias.reshape(E).astype(jnp.float32)

    cost = pl.CostEstimate(
        flops=8 * N * E,
        transcendentals=N,  # one rsqrt per row
        bytes_accessed=2 * N * E * itemsize + 2 * E * 4,
    )

    if E % 128 == 0:
        # Lane-aligned hidden size: stream (TM, E) row tiles, reduce over lanes.
        TM = _pick_row_tile(N, E, itemsize, align=8)
        out = pl.pallas_call(
            functools.partial(_ln_kernel_rows, eps=float(eps)),
            out_shape=jax.ShapeDtypeStruct((N, E), x.dtype),
            grid_spec=pl.GridSpec(
                grid=(pl.cdiv(N, TM),),
                in_specs=[
                    pl.BlockSpec((TM, E), lambda i: (i, 0)),   # x: tiled over rows
                    pl.BlockSpec((1, E), lambda i: (0, 0)),    # weight: resident
                    pl.BlockSpec((1, E), lambda i: (0, 0)),    # bias: resident
                ],
                out_specs=pl.BlockSpec((TM, E), lambda i: (i, 0)),
            ),
            compiler_params=pltpu.CompilerParams(
                dimension_semantics=("parallel",),
                vmem_limit_bytes=_vmem_limit(TM, E, itemsize),
            ),
            cost_estimate=cost,
        )(x2d, w.reshape(1, E), b.reshape(1, E))
        return out.reshape(*lead_shape, *hidden_size)

    # E not a multiple of 128: lane-dense layout. Wrapper-side transpose (layout
    # plumbing only) puts the row axis on lanes so stores are unmasked full-lane vst.
    xT = x2d.T                                         # (E, N)
    TM = _pick_row_tile(N, E, itemsize, align=128)
    outT = pl.pallas_call(
        functools.partial(_ln_kernel_cols, eps=float(eps)),
        out_shape=jax.ShapeDtypeStruct((E, N), x.dtype),
        grid_spec=pl.GridSpec(
            grid=(pl.cdiv(N, TM),),
            in_specs=[
                pl.BlockSpec((E, TM), lambda i: (0, i)),   # x^T: tiled over columns
                pl.BlockSpec((E, 1), lambda i: (0, 0)),    # weight: resident
                pl.BlockSpec((E, 1), lambda i: (0, 0)),    # bias: resident
            ],
            out_specs=pl.BlockSpec((E, TM), lambda i: (0, i)),
        ),
        compiler_params=pltpu.CompilerParams(
            dimension_semantics=("parallel",),
            vmem_limit_bytes=_vmem_limit(TM, E, itemsize),
        ),
        cost_estimate=cost,
    )(xT, w.reshape(E, 1), b.reshape(E, 1))
    return outT.T.reshape(*lead_shape, *hidden_size)


def reference_esm1_layernorm(x, weight, bias, *, hidden_size, eps=1e-12):
    hidden_size = (hidden_size,) if isinstance(hidden_size, int) else tuple(hidden_size)
    dims = tuple(range(-len(hidden_size), 0))
    mean = jnp.mean(x, axis=dims, keepdims=True)
    xc = x - mean
    var = jnp.mean(xc * xc, axis=dims, keepdims=True)
    y = xc / jnp.sqrt(var + eps)
    if weight is None:
        return y
    return weight * y + bias


if __name__ == "__main__":
    key = jax.random.PRNGKey(0)
    kx, kw, kb, kx2, kw2, kb2 = jax.random.split(key, 6)

    # Small hidden (E % 128 != 0) -> lane-dense transposed path.
    batch, seq, hidden = 2, 8, 32
    x = jax.random.normal(kx, (batch, seq, hidden), dtype=jnp.float32)
    weight = jax.random.normal(kw, (hidden,), dtype=jnp.float32)
    bias = jax.random.normal(kb, (hidden,), dtype=jnp.float32)

    out = esm1_layernorm_pallas(x, weight, bias, hidden_size=hidden, eps=1e-12)
    jax.block_until_ready(out)
    ref = reference_esm1_layernorm(x, weight, bias, hidden_size=hidden, eps=1e-12)
    assert out.shape == x.shape, out.shape
    err = float(jnp.max(jnp.abs(out - ref)))
    assert jnp.allclose(out, ref, atol=1e-5, rtol=1e-5), err

    # Lane-aligned hidden (E % 128 == 0) -> row-tiled path (also exercises 2-tile grid).
    hidden2 = 128
    x2 = jax.random.normal(kx2, (batch, seq, hidden2), dtype=jnp.float32)
    w2 = jax.random.normal(kw2, (hidden2,), dtype=jnp.float32)
    b2 = jax.random.normal(kb2, (hidden2,), dtype=jnp.float32)

    out2 = esm1_layernorm_pallas(x2, w2, b2, hidden_size=hidden2, eps=1e-12)
    jax.block_until_ready(out2)
    ref2 = reference_esm1_layernorm(x2, w2, b2, hidden_size=hidden2, eps=1e-12)
    err2 = float(jnp.max(jnp.abs(out2 - ref2)))
    assert jnp.allclose(out2, ref2, atol=1e-5, rtol=1e-5), err2

    print("KERNEL_OK")
</pallas_src>

<mosaic_0001>
module attributes {stable_mosaic.version = 11 : i64} {
  func.func @_ln_kernel_cols(%arg0: i32, %arg1: memref<32x16xf32, #tpu.memory_space<vmem>>, %arg2: memref<32x1xf32, #tpu.memory_space<vmem>>, %arg3: memref<32x1xf32, #tpu.memory_space<vmem>>, %arg4: memref<32x16xf32, #tpu.memory_space<vmem>>) attributes {dimension_semantics = [#tpu.dimension_semantics<parallel>], iteration_bounds = array<i64: 1>, scalar_prefetch = 0 : i64, scratch_operands = 0 : i64, tpu.core_type = #tpu.core_type<tc>, window_params = [{transform_indices = @transform_0, window_bounds = array<i64: 32, 16>}, {pipeline_mode = #tpu.pipeline_mode<synchronous>, transform_indices = @transform_1, window_bounds = array<i64: 32, 1>}, {pipeline_mode = #tpu.pipeline_mode<synchronous>, transform_indices = @transform_2, window_bounds = array<i64: 32, 1>}, {transform_indices = @transform_3, window_bounds = array<i64: 32, 16>}]} {
    %c0 = arith.constant 0 : index
    %c0_0 = arith.constant 0 : index
    %0 = vector.load %arg1[%c0, %c0_0] : memref<32x16xf32, #tpu.memory_space<vmem>>, vector<32x16xf32>
    %cst = arith.constant dense<0.000000e+00> : vector<16xf32>
    %1 = vector.multi_reduction <add>, %0, %cst [0] : vector<32x16xf32> to vector<16xf32>
    %2 = vector.shape_cast %1 : vector<16xf32> to vector<1x16xf32>
    %cst_1 = arith.constant 3.200000e+01 : f32
    %3 = vector.broadcast %cst_1 : f32 to vector<1x16xf32>
    %4 = arith.divf %2, %3 : vector<1x16xf32>
    %5 = vector.broadcast %4 : vector<1x16xf32> to vector<32x16xf32>
    %6 = arith.subf %0, %5 : vector<32x16xf32>
    %7 = arith.mulf %6, %6 : vector<32x16xf32>
    %cst_2 = arith.constant dense<0.000000e+00> : vector<16xf32>
    %8 = vector.multi_reduction <add>, %7, %cst_2 [0] : vector<32x16xf32> to vector<16xf32>
    %9 = vector.shape_cast %8 : vector<16xf32> to vector<1x16xf32>
    %cst_3 = arith.constant 3.200000e+01 : f32
    %10 = vector.broadcast %cst_3 : f32 to vector<1x16xf32>
    %11 = arith.divf %9, %10 : vector<1x16xf32>
    %cst_4 = arith.constant 9.99999996E-13 : f32
    %12 = vector.broadcast %cst_4 : f32 to vector<1x16xf32>
    %13 = arith.addf %11, %12 : vector<1x16xf32>
    %14 = math.rsqrt %13 : vector<1x16xf32>
    %15 = vector.broadcast %14 : vector<1x16xf32> to vector<32x16xf32>
    %16 = arith.mulf %6, %15 : vector<32x16xf32>
    %c0_5 = arith.constant 0 : index
    %c0_6 = arith.constant 0 : index
    %17 = vector.load %arg2[%c0_5, %c0_6] : memref<32x1xf32, #tpu.memory_space<vmem>>, vector<32x1xf32>
    %18 = vector.broadcast %17 : vector<32x1xf32> to vector<32x16xf32>
    %19 = arith.mulf %16, %18 : vector<32x16xf32>
    %c0_7 = arith.constant 0 : index
    %c0_8 = arith.constant 0 : index
    %20 = vector.load %arg3[%c0_7, %c0_8] : memref<32x1xf32, #tpu.memory_space<vmem>>, vector<32x1xf32>
    %21 = vector.broadcast %20 : vector<32x1xf32> to vector<32x16xf32>
    %22 = arith.addf %19, %21 : vector<32x16xf32>
    %c0_9 = arith.constant 0 : index
    %c0_10 = arith.constant 0 : index
    %23 = vector.load %arg4[%c0_9, %c0_10] : memref<32x16xf32, #tpu.memory_space<vmem>>, vector<32x16xf32>
    tpu.vector_store %arg4[%c0_9, %c0_10], %22 {strides = array<i32>} : memref<32x16xf32, #tpu.memory_space<vmem>>, vector<32x16xf32>,
    return
  }
  func.func @transform_0(%arg0: i32) -> (i32, i32) {
    %c0_i32 = arith.constant 0 : i32
    %c0_i32_0 = arith.constant 0 : i32
    return %c0_i32, %arg0 : i32, i32
  }
  func.func @transform_1(%arg0: i32) -> (i32, i32) {
    %c0_i32 = arith.constant 0 : i32
    %c0_i32_0 = arith.constant 0 : i32
    %c0_i32_1 = arith.constant 0 : i32
    return %c0_i32, %c0_i32_0 : i32, i32
  }
  func.func @transform_2(%arg0: i32) -> (i32, i32) {
    %c0_i32 = arith.constant 0 : i32
    %c0_i32_0 = arith.constant 0 : i32
    %c0_i32_1 = arith.constant 0 : i32
    return %c0_i32, %c0_i32_0 : i32, i32
  }
  func.func @transform_3(%arg0: i32) -> (i32, i32) {
    %c0_i32 = arith.constant 0 : i32
    %c0_i32_0 = arith.constant 0 : i32
    return %c0_i32, %arg0 : i32, i32
  }
}

</mosaic_0001>

<bundles_post_ra>
// kernel: tpu_custom_call.1
= control target key start
LH: loop header
LB: loop body
LE: loop exit
PB: predicated region body
PF: predicated region fallthrough
CT: control target
= control target key end

     0   :  { %v150_v0 = vmov 0   ;;  %vm18_vm0 = vcmask 130048   ;;  %v151_v16 = vmov 32.0   ;;  %s232_s1 = inlined_call_operand.vmem [shape: f32[32,1], index: 1, kind: input, shape index: {}]   ;;  %s233_s2 = inlined_call_operand.vmem [shape: f32[32,1], index: 2, kind: input, shape index: {}]   ;;  %s234_s0 = inlined_call_operand.vmem [shape: f32[32,16], index: 0, kind: input, shape index: {}]   ;;  %s235_s3 = inlined_call_operand.vmem [shape: f32[32,16], index: 3, kind: output, shape index: {}]  }
   0x1   :  { %144 = vset.pattern.permute.xlu1 %v150_v0  ;;  %143 = vset.pattern.permute.xlu0 %v150_v0  ;;  %v79_v1 = vld [vmem:[%s232_s1 + $0x10] sm:$0xff]  ;;  %v77_v2 = vld [vmem:[%s232_s1] sm:$0xff]  ;;  %v80_v4 = vld [vmem:[%s232_s1 + $0x18] sm:$0xff]  ;;  %146 = vrcp.f32 %v151_v16 }
   0x2   :  { %93 = vperm.xlu1 %144, %v79_v1   ;;  %83 = vperm.xlu0 %143, %v77_v2   ;;  %v105_v3 = vld [vmem:[%s233_s2] sm:$0xff]  ;;  %v78_v5 = vld [vmem:[%s232_s1 + $0x8] sm:$0xff]  ;;  %v108_v7 = vld [vmem:[%s233_s2 + $0x18] sm:$0xff] }
   0x3   :  { %145 = vset.pattern.permute.xlu2 %v150_v0  ;;  %v106_v6 = vld [vmem:[%s233_s2 + $0x8] sm:$0xff]  ;;  %v107_v8 = vld [vmem:[%s233_s2 + $0x10] sm:$0xff]  ;;  %v14_v9 = vld [vmem:[%s234_s0] sm:$0xff] }
   0x4   :  { %111 = vperm.xlu2 %145, %v105_v3   ;;  %v15_v10 = vld [vmem:[%s234_s0 + $0x8] sm:$0xff]  ;;  %v19_v11 = vsel %vm18_vm0, %v14_v9, 0.0  ;;  %v16_v13 = vld [vmem:[%s234_s0 + $0x10] sm:$0xff]  ;;  %v17_v17 = vld [vmem:[%s234_s0 + $0x18] sm:$0xff] }
   0x5   :  { %v20_v12 = vsel %vm18_vm0, %v15_v10, 0.0  ;;  %v22_v15 = vsel %vm18_vm0, %v16_v13, 0.0  ;;  %v24_v19 = vsel %vm18_vm0, %v17_v17, 0.0 }
   0x6   :  { %v21_v14 = vadd.f32 %v20_v12, %v19_v11 }
   0x7   :  { %v147_v22 = vpop.eup %146 }
   0x8   :  { %v23_v18 = vadd.f32 %v22_v15, %v21_v14  ;;  %v33_v24 = vmul.f32 32.0, %v147_v22  ;;  %vm37_vm1 = vweird.f32 %v147_v22 }
   0xa   :  { %98 = vperm.xlu1 %144, %v80_v4   ;;  %88 = vperm.xlu0 %143, %v78_v5   ;;  %v25_v20 = vadd.f32 %v24_v19, %v23_v18  ;;  %v34_v26 = vsub.f32 1.0, %v33_v24 }
   0xc   :  { %116 = vperm.xlu2 %145, %v106_v6   ;;  %v26_v21 = vrot.slane %v25_v20, 4  ;;  %v35_v28 = vmul.f32 %v147_v22, %v34_v26 }
   0xe   :  { %v27_v23 = vadd.f32 %v26_v21, %v25_v20  ;;  %v36_v30 = vadd.f32 %v147_v22, %v35_v28 }
  0x10   :  { %v28_v25 = vrot.slane %v27_v23, 2  ;;  %v38_v32 = vsel %vm37_vm1, %v147_v22, %v36_v30 }
  0x12   :  { %126 = vperm.xlu1 %144, %v108_v7   ;;  %121 = vperm.xlu0 %143, %v107_v8   ;;  %v29_v27 = vadd.f32 %v28_v25, %v27_v23 }
  0x14   :  { %v30_v29 = vrot.slane %v29_v27, 1 }
  0x16   :  { %v31_v31 = vadd.f32 %v30_v29, %v29_v27 }
  0x18   :  { %v39_v33 = vmul.f32 %v38_v32, %v31_v31 }
  0x1a   :  { %v40_v34 = vsub.f32 %v14_v9, %v39_v33  ;;  %v41_v35 = vsub.f32 %v15_v10, %v39_v33  ;;  %v42_v36 = vsub.f32 %v16_v13, %v39_v33  ;;  %v43_v39 = vsub.f32 %v17_v17, %v39_v33 }
  0x1c   :  { %v44_v37 = vmul.f32 %v40_v34, %v40_v34  ;;  %v45_v38 = vmul.f32 %v41_v35, %v41_v35  ;;  %v46_v40 = vmul.f32 %v42_v36, %v42_v36  ;;  %v47_v44 = vmul.f32 %v43_v39, %v43_v39 }
  0x1e   :  { %v48_v41 = vsel %vm18_vm0, %v44_v37, 0.0  ;;  %v49_v42 = vsel %vm18_vm0, %v45_v38, 0.0  ;;  %v51_v45 = vsel %vm18_vm0, %v46_v40, 0.0  ;;  %v53_v47 = vsel %vm18_vm0, %v47_v44, 0.0 }
  0x1f   :  { %v50_v43 = vadd.f32 %v49_v42, %v48_v41 }
  0x21   :  { %v52_v46 = vadd.f32 %v51_v45, %v50_v43 }
  0x23   :  { %v54_v48 = vadd.f32 %v53_v47, %v52_v46 }
  0x25   :  { %v55_v49 = vrot.slane %v54_v48, 4 }
  0x27   :  { %v56_v50 = vadd.f32 %v55_v49, %v54_v48 }
  0x29   :  { %v57_v51 = vrot.slane %v56_v50, 2 }
  0x2b   :  { %v58_v52 = vadd.f32 %v57_v51, %v56_v50 }
  0x2d   :  { %v59_v53 = vrot.slane %v58_v52, 1 }
  0x2f   :  { %v60_v54 = vadd.f32 %v59_v53, %v58_v52 }
  0x31   :  { %v61_v55 = vmul.f32 %v60_v54, %v38_v32 }
  0x33   :  { %v62_v56 = vadd.f32 1e-12, %v61_v55 }
  0x35   :  { %148 = vrsqrt.f32 %v62_v56  ;;  %vm69_vm2 = vweird.f32 %v62_v56 }
  0x3b   :  { %v149_v57 = vpop.eup %148 }
  0x3c   :  { %v64_v58 = vmul.f32 %v149_v57, %v62_v56  ;;  %vm70_vm3 = vweird.f32 %v149_v57 }
  0x3d   :  { %vm71_vm4 = vmor %vm69_vm2, %vm70_vm3 }
  0x3e   :  { %v65_v59 = vmul.f32 %v149_v57, %v64_v58 }
  0x40   :  { %v66_v60 = vmul.f32 0.5, %v65_v59 }
  0x42   :  { %v67_v61 = vsub.f32 1.5, %v66_v60 }
  0x44   :  { %v68_v62 = vmul.f32 %v149_v57, %v67_v61 }
  0x46   :  { %v72_v63 = vsel %vm71_vm4, %v149_v57, %v68_v62 }
  0x47   :  { %v73_v0 = vmul.f32 %v72_v63, %v40_v34  ;;  %v74_v6 = vmul.f32 %v72_v63, %v41_v35  ;;  %v75_v11 = vmul.f32 %v72_v63, %v42_v36  ;;  %v76_v12 = vmul.f32 %v72_v63, %v43_v39 }
  0x5e   :  { %v112_v1 = vpop.permute.xlu2 %111 }
  0x66   :  { %v117_v10 = vpop.permute.xlu2 %116 }
  0x74   :  { %v94_v2 = vpop.permute.xlu1 %93  ;;  %v84_v3 = vpop.permute.xlu0 %83 }
  0x75   :  { %v101_v4 = vmul.f32 %v84_v3, %v73_v0  ;;  %v103_v14 = vmul.f32 %v94_v2, %v75_v11 }
  0x77   :  { %v129_v5 = vadd.f32 %v112_v1, %v101_v4 }
  0x79   :  { %133 = vst.msk [vmem:[%s235_s3] sm:$0xff] %vm18_vm0, %v129_v5 }
  0x7c   :  { %v99_v7 = vpop.permute.xlu1 %98  ;;  %v89_v8 = vpop.permute.xlu0 %88 }
  0x7d   :  { %v102_v9 = vmul.f32 %v89_v8, %v74_v6  ;;  %v104_v15 = vmul.f32 %v99_v7, %v76_v12 }
  0x7f   :  { %v130_v13 = vadd.f32 %v117_v10, %v102_v9 }
  0x81   :  { %134 = vst.msk [vmem:[%s235_s3 + $0x8] sm:$0xff] %vm18_vm0, %v130_v13 }
  0x84   :  { %v127_v16 = vpop.permute.xlu1 %126  ;;  %v122_v17 = vpop.permute.xlu0 %121 }
  0x85   :  { %v132_v18 = vadd.f32 %v127_v16, %v104_v15  ;;  %v131_v19 = vadd.f32 %v122_v17, %v103_v14 }
  0x87   :  { %136 = vst.msk [vmem:[%s235_s3 + $0x18] sm:$0xff] %vm18_vm0, %v132_v18 }
  0x88   :  { %135 = vst.msk [vmem:[%s235_s3 + $0x10] sm:$0xff] %vm18_vm0, %v131_v19 }

</bundles_post_ra>
